<compile_context>
chip_gen: v5e
topology: v5e:2x2
jax: 0.10.0
libtpu: 0.0.40
codegen_flags: <defaults>
</compile_context>

<pallas_src>
import functools
from typing import NamedTuple, Optional

import jax
import jax.numpy as jnp
from jax.experimental import pallas as pl
from jax.experimental.pallas import tpu as pltpu


_ALPHA = 0.25                 # LeakyReLU negative slope used by the PyTorch module
_MiB = 1024 * 1024
_MAX_FULL_K = 2048            # up to this C_in, keep K un-tiled (single K block)


# -----------------------------------------------------------------------------
# small helpers
# -----------------------------------------------------------------------------
def _round_up(x, m):
    return ((x + m - 1) // m) * m


def _pad_to(a, axis, mult):
    size = a.shape[axis]
    pad = (-size) % mult
    if pad == 0:
        return a
    widths = [(0, 0)] * a.ndim
    widths[axis] = (0, pad)
    return jnp.pad(a, widths)


def _pick_tile(total, unit, max_tile):
    """Largest multiple of `unit` <= max_tile that divides `total` (total % unit == 0)."""
    if total <= max_tile:
        return total
    t = (max_tile // unit) * unit
    while t > unit:
        if total % t == 0:
            return t
        t -= unit
    return unit


@functools.lru_cache(maxsize=1)
def _vmem_budgets():
    """(vmem_limit_bytes, resident_weight_budget) tuned per TPU generation."""
    try:
        info = pltpu.get_tpu_info()
        cap = getattr(info, "vmem_capacity_bytes", None) or 64 * _MiB
    except Exception:
        cap = 64 * _MiB                       # conservative (v7x per-core) fallback
    if cap >= 100 * _MiB:                     # v5e / v6e: 128 MiB physical VMEM
        return 96 * _MiB, 64 * _MiB
    return 48 * _MiB, 32 * _MiB               # v7x: 64 MiB per TensorCore


# -----------------------------------------------------------------------------
# prepared (cached) parameters
# -----------------------------------------------------------------------------
class ConvParams(NamedTuple):
    w: jax.Array                  # (K, Cp)  transposed, lane-padded, compute dtype
    scale: Optional[jax.Array]    # (1, Cp) f32 (BN) or None
    shift: Optional[jax.Array]    # (1, Cp) f32 (BN) or None
    c_in: int
    c_out: int


def prepare_conv_params(weight, *, bn=False, bn_gamma=None, bn_beta=None,
                        bn_mean=None, bn_var=None, eps=1e-5,
                        compute_dtype=jnp.bfloat16):
    """One-time weight prep (call at parameter-load time, reuse every forward).

    weight : (C_out, C_in, 1, 1) Conv2d weight (bias=False).
    BN is eval-mode: per-channel scale/shift kept as separate f32 vectors and
    applied in the kernel epilogue (NOT folded into the weight on the host).
    """
    # TODO(synk): training-mode BatchNorm (batch statistics) is not implemented.
    C_out, C_in = int(weight.shape[0]), int(weight.shape[1])
    w_t = jnp.asarray(weight, jnp.float32).reshape(C_out, C_in).T    # (C_in, C_out)
    w_t = _pad_to(w_t, 1, 128)            # lane-dense output stores (full `vst`)
    if C_in > _MAX_FULL_K:
        w_t = _pad_to(w_t, 0, 128)        # enables K tiling with zero per-call pad
    Cp = w_t.shape[1]

    scale = shift = None
    if bn:
        s = jnp.asarray(bn_gamma, jnp.float32) * jax.lax.rsqrt(
            jnp.asarray(bn_var, jnp.float32) + eps)
        sh = jnp.asarray(bn_beta, jnp.float32) - jnp.asarray(bn_mean, jnp.float32) * s
        scale = jnp.pad(s.reshape(1, C_out), ((0, 0), (0, Cp - C_out)))
        shift = jnp.pad(sh.reshape(1, C_out), ((0, 0), (0, Cp - C_out)))

    return ConvParams(w=w_t.astype(compute_dtype), scale=scale, shift=shift,
                      c_in=C_in, c_out=C_out)


# -----------------------------------------------------------------------------
# Path A kernel: full weight resident in VMEM (constant block index -> one DMA),
# one batch tile per grid step.  y = x @ w ; [*scale + shift] ; [LeakyReLU].
# -----------------------------------------------------------------------------
def _resident_kernel(*refs, affine, relu):
    if affine:
        x_ref, w_ref, scale_ref, shift_ref, o_ref = refs
    else:
        x_ref, w_ref, o_ref = refs
        scale_ref = shift_ref = None
    y = jnp.dot(x_ref[...], w_ref[...], preferred_element_type=jnp.float32)  # MXU
    if affine:
        y = y * scale_ref[...] + shift_ref[...]          # f32 epilogue (VPU)
    if relu:
        y = jnp.where(y >= 0, y, _ALPHA * y)
    o_ref[...] = y.astype(o_ref.dtype)


# -----------------------------------------------------------------------------
# Path B kernel: tiled matmul, K reduction on the last ("arbitrary") grid axis,
# accumulating directly into the f32 output block (no scratch).
# -----------------------------------------------------------------------------
def _tiled_kernel(*refs, affine, relu):
    if affine:
        x_ref, w_ref, scale_ref, shift_ref, o_ref = refs
    else:
        x_ref, w_ref, o_ref = refs
        scale_ref = shift_ref = None
    k = pl.program_id(2)

    @pl.when(k == 0)
    def _():
        o_ref[...] = jnp.zeros_like(o_ref)

    o_ref[...] += jnp.dot(x_ref[...], w_ref[...],
                          preferred_element_type=jnp.float32)

    @pl.when(k == pl.num_programs(2) - 1)
    def _():
        y = o_ref[...]
        if affine:
            y = y * scale_ref[...] + shift_ref[...]
        if relu:
            y = jnp.where(y >= 0, y, _ALPHA * y)
        o_ref[...] = y


# -----------------------------------------------------------------------------
# forward
# -----------------------------------------------------------------------------
def conv_forward(x_nchw, params: ConvParams, *, relu=False, force_tiled=False):
    """Forward pass of the `conv` head.

    x_nchw : (B, C_in, 1, 1) float32 (NCHW, matching PyTorch)
    params : ConvParams from prepare_conv_params (prepared once, reused)
    returns: (B, C_out) float32  (after .squeeze(3).squeeze(2))
    """
    B, C_in, H, W = x_nchw.shape
    assert H == 1 and W == 1, "module squeezes dims 2 and 3; expects H == W == 1"
    assert C_in == params.c_in
    K, Cp = params.w.shape
    C_out = params.c_out
    affine = params.scale is not None
    cdt = params.w.dtype
    itm = cdt.itemsize

    x2 = x_nchw.reshape(B, C_in).astype(cdt)
    if K != C_in:                               # K was padded in prep (huge C_in)
        x2 = jnp.pad(x2, ((0, 0), (0, K - C_in)))

    limit, resident_budget = _vmem_budgets()

    # ------------------------------------------------------------------
    # Path A: weight fully resident in VMEM, batch-only grid.
    # ------------------------------------------------------------------
    if B <= 128:
        TM_A, Bp_A = B, B                       # full-array blocks, grid=(1,)
    else:
        TM_A = 256 if B <= 2048 else 512        # >=2 steps -> both v7x TCs busy
        Bp_A = _round_up(B, TM_A)
    vmem_a = (2 * K * Cp * itm                  # weight (default double buffer)
              + 2 * TM_A * K * itm              # x tiles
              + 2 * TM_A * Cp * 4               # f32 output tiles
              + (4 * Cp * 4 if affine else 0))  # scale + shift

    if (not force_tiled) and vmem_a <= resident_budget:
        x_p = x2 if Bp_A == B else _pad_to(x2, 0, TM_A)
        in_specs = [
            pl.BlockSpec((TM_A, K), lambda i: (i, 0)),      # x batch tile
            pl.BlockSpec((K, Cp), lambda i: (0, 0)),        # weight, resident
        ]
        inputs = [x_p, params.w]
        if affine:
            in_specs += [pl.BlockSpec((1, Cp), lambda i: (0, 0)),
                         pl.BlockSpec((1, Cp), lambda i: (0, 0))]
            inputs += [params.scale, params.shift]

        cost = pl.CostEstimate(
            flops=2 * Bp_A * K * Cp, transcendentals=0,
            bytes_accessed=int(x_p.size * itm + params.w.size * itm
                               + Bp_A * Cp * 4 + (8 * Cp if affine else 0)))

        out = pl.pallas_call(
            functools.partial(_resident_kernel, affine=affine, relu=relu),
            out_shape=jax.ShapeDtypeStruct((Bp_A, Cp), jnp.float32),
            grid_spec=pltpu.PrefetchScalarGridSpec(
                num_scalar_prefetch=0,
                grid=(Bp_A // TM_A,),
                in_specs=in_specs,
                out_specs=pl.BlockSpec((TM_A, Cp), lambda i: (i, 0)),
            ),
            compiler_params=pltpu.CompilerParams(
                dimension_semantics=("parallel",),
                vmem_limit_bytes=limit),
            cost_estimate=cost,
        )(*inputs)
        if Bp_A != B or Cp != C_out:
            out = out[:B, :C_out]
        return out

    # ------------------------------------------------------------------
    # Path B: tiled matmul; tiles chosen to avoid K/N padding; K reduction on
    # the trailing "arbitrary" axis accumulating into the f32 output block.
    # ------------------------------------------------------------------
    TM = min(512, _round_up(B, 8))
    small_m = TM <= 64
    if K % 128 == 0:
        TK = _pick_tile(K, 128, 2048 if small_m else 1024)
    else:
        TK = K                                   # full-K block (K <= _MAX_FULL_K)
    TN = _pick_tile(Cp, 128, 512 if small_m else 256)

    x_p = _pad_to(x2, 0, TM)
    Bp = x_p.shape[0]
    grid = (Bp // TM, Cp // TN, K // TK)

    in_specs = [
        pl.BlockSpec((TM, TK), lambda i, j, k: (i, k)),
        pl.BlockSpec((TK, TN), lambda i, j, k: (k, j)),
    ]
    inputs = [x_p, params.w]
    if affine:
        in_specs += [pl.BlockSpec((1, TN), lambda i, j, k: (0, j)),
                     pl.BlockSpec((1, TN), lambda i, j, k: (0, j))]
        inputs += [params.scale, params.shift]

    cost = pl.CostEstimate(
        flops=2 * Bp * K * Cp, transcendentals=0,
        bytes_accessed=int(x_p.size * itm * (Cp // TN)
                           + params.w.size * itm * (Bp // TM)
                           + Bp * Cp * 4))

    out = pl.pallas_call(
        functools.partial(_tiled_kernel, affine=affine, relu=relu),
        out_shape=jax.ShapeDtypeStruct((Bp, Cp), jnp.float32),
        grid_spec=pltpu.PrefetchScalarGridSpec(
            num_scalar_prefetch=0,
            grid=grid,
            in_specs=in_specs,
            out_specs=pl.BlockSpec((TM, TN), lambda i, j, k: (i, j)),
        ),
        compiler_params=pltpu.CompilerParams(
            dimension_semantics=("parallel", "parallel", "arbitrary"),
            vmem_limit_bytes=limit),
        cost_estimate=cost,
    )(*inputs)
    if Bp != B or Cp != C_out:
        out = out[:B, :C_out]
    return out


# -----------------------------------------------------------------------------
# Deterministic parameter init (mirrors weights_init_kaiming for Conv2d:
# kaiming_normal_, mode='fan_out', nonlinearity='relu' => std = sqrt(2 / fan_out))
# -----------------------------------------------------------------------------
def init_conv_weight(key, input_dim, output_dim):
    fan_out = output_dim * 1 * 1
    std = (2.0 / fan_out) ** 0.5
    return std * jax.random.normal(key, (output_dim, input_dim, 1, 1), jnp.float32)


if __name__ == "__main__":
    key = jax.random.PRNGKey(0)
    ks = jax.random.split(key, 10)

    # --- 1) tiny module-typical shape, default bf16 compute, no BN / no relu ---
    B, C_in, C_out = 2, 4, 32
    x = jax.random.normal(ks[0], (B, C_in, 1, 1), jnp.float32)
    w = init_conv_weight(ks[1], C_in, C_out)
    ref = x.reshape(B, C_in) @ w.reshape(C_out, C_in).T

    params_bf16 = prepare_conv_params(w)                       # prepared once, reused
    out = jax.block_until_ready(conv_forward(x, params_bf16))
    assert out.shape == (B, C_out)
    assert jnp.allclose(out, ref, atol=3e-2, rtol=3e-2)

    params_f32 = prepare_conv_params(w, compute_dtype=jnp.float32)
    out32 = jax.block_until_ready(conv_forward(x, params_f32))
    assert jnp.allclose(out32, ref, atol=1e-5, rtol=1e-5)

    # --- 2) BN (eval mode) + LeakyReLU(0.25); scale/shift in the f32 epilogue ---
    gamma = 1.0 + 0.1 * jax.random.normal(ks[2], (C_out,), jnp.float32)
    beta = 0.1 * jax.random.normal(ks[3], (C_out,), jnp.float32)
    mean = 0.1 * jax.random.normal(ks[4], (C_out,), jnp.float32)
    var = jnp.abs(jax.random.normal(ks[5], (C_out,), jnp.float32)) + 0.5
    params_bn = prepare_conv_params(w, bn=True, bn_gamma=gamma, bn_beta=beta,
                                    bn_mean=mean, bn_var=var,
                                    compute_dtype=jnp.float32)
    out_bn = jax.block_until_ready(conv_forward(x, params_bn, relu=True))
    scale = gamma / jnp.sqrt(var + 1e-5)
    y_ref = ref * scale[None, :] + (beta - mean * scale)[None, :]
    ref_bn = jnp.where(y_ref >= 0, y_ref, _ALPHA * y_ref)
    assert jnp.allclose(out_bn, ref_bn, atol=1e-4, rtol=1e-4)

    # --- 3) batch-tiled resident path (B > 128): padding + lane-padded slice ---
    B3, Ci3, Co3 = 300, 64, 32
    x3 = jax.random.normal(ks[6], (B3, Ci3, 1, 1), jnp.float32)
    w3 = init_conv_weight(ks[7], Ci3, Co3)
    p3 = prepare_conv_params(w3, compute_dtype=jnp.float32)
    out3 = jax.block_until_ready(conv_forward(x3, p3))
    ref3 = x3.reshape(B3, Ci3) @ w3.reshape(Co3, Ci3).T
    assert out3.shape == (B3, Co3)
    assert jnp.allclose(out3, ref3, atol=1e-4, rtol=1e-4)

    # --- 4) forced tiled path: C_in=640 -> full-K block, zero K padding ---
    B4, Ci4, Co4 = 16, 640, 160
    x4 = jax.random.normal(ks[8], (B4, Ci4, 1, 1), jnp.float32)
    w4 = init_conv_weight(ks[9], Ci4, Co4)
    p4 = prepare_conv_params(w4, compute_dtype=jnp.float32)
    out4 = jax.block_until_ready(conv_forward(x4, p4, relu=True, force_tiled=True))
    r4 = x4.reshape(B4, Ci4) @ w4.reshape(Co4, Ci4).T
    ref4 = jnp.where(r4 >= 0, r4, _ALPHA * r4)
    assert out4.shape == (B4, Co4)
    assert jnp.allclose(out4, ref4, atol=1e-4, rtol=1e-4)

    print("KERNEL_OK")
</pallas_src>

<mosaic_0001>
module attributes {stable_mosaic.version = 11 : i64} {
  func.func @_resident_kernel(%arg0: i32, %arg1: memref<2x4xbf16, #tpu.memory_space<vmem>>, %arg2: memref<4x128xbf16, #tpu.memory_space<vmem>>, %arg3: memref<2x128xf32, #tpu.memory_space<vmem>>) attributes {dimension_semantics = [#tpu.dimension_semantics<parallel>], iteration_bounds = array<i64: 1>, scalar_prefetch = 0 : i64, scratch_operands = 0 : i64, tpu.core_type = #tpu.core_type<tc>, window_params = [{transform_indices = @transform_0, window_bounds = array<i64: 2, 4>}, {pipeline_mode = #tpu.pipeline_mode<synchronous>, transform_indices = @transform_1, window_bounds = array<i64: 4, 128>}, {transform_indices = @transform_2, window_bounds = array<i64: 2, 128>}]} {
    %c0 = arith.constant 0 : index
    %c0_0 = arith.constant 0 : index
    %0 = vector.load %arg1[%c0, %c0_0] : memref<2x4xbf16, #tpu.memory_space<vmem>>, vector<2x4xbf16>
    %c0_1 = arith.constant 0 : index
    %c0_2 = arith.constant 0 : index
    %1 = vector.load %arg2[%c0_1, %c0_2] : memref<4x128xbf16, #tpu.memory_space<vmem>>, vector<4x128xbf16>
    %cst = arith.constant dense<0.000000e+00> : vector<2x128xf32>
    %2 = tpu.matmul %0, %1, %cst {dimension_numbers = #tpu.dot_dimension_numbers<[1], [0], [0], [1], [0, 0, 1, 1], [], []>} : vector<2x4xbf16>, vector<4x128xbf16>, vector<2x128xf32> -> vector<2x128xf32>
    %c0_3 = arith.constant 0 : index
    %c0_4 = arith.constant 0 : index
    %3 = vector.load %arg3[%c0_3, %c0_4] : memref<2x128xf32, #tpu.memory_space<vmem>>, vector<2x128xf32>
    tpu.vector_store %arg3[%c0_3, %c0_4], %2 {strides = array<i32>} : memref<2x128xf32, #tpu.memory_space<vmem>>, vector<2x128xf32>,
    return
  }
  func.func @transform_0(%arg0: i32) -> (i32, i32) {
    %c0_i32 = arith.constant 0 : i32
    %c0_i32_0 = arith.constant 0 : i32
    return %arg0, %c0_i32 : i32, i32
  }
  func.func @transform_1(%arg0: i32) -> (i32, i32) {
    %c0_i32 = arith.constant 0 : i32
    %c0_i32_0 = arith.constant 0 : i32
    %c0_i32_1 = arith.constant 0 : i32
    return %c0_i32, %c0_i32_0 : i32, i32
  }
  func.func @transform_2(%arg0: i32) -> (i32, i32) {
    %c0_i32 = arith.constant 0 : i32
    %c0_i32_0 = arith.constant 0 : i32
    return %arg0, %c0_i32 : i32, i32
  }
}

</mosaic_0001>

<bundles_post_ra>
// kernel: tpu_custom_call.1
= control target key start
LH: loop header
LB: loop body
LE: loop exit
PB: predicated region body
PF: predicated region fallthrough
CT: control target
= control target key end

     0   :  { %7 = vsyncpa [#allocation3], 0  ;;  %s192_s0 = inlined_call_operand.hbm [shape: bf16[2,4], index: 0, kind: input, shape index: {}]   ;;  %s193_s1 = inlined_call_operand.hbm [shape: bf16[4,128], index: 1, kind: input, shape index: {}]   ;;  %s194_s2 = inlined_call_operand.hbm [shape: f32[2,128], index: 2, kind: output, shape index: {}]  }
   0x1   :  { %8 = vsyncpa [#allocation6], 0 }
   0x2   :  { %9 = vsyncpa [#allocation4], 0  ;;  %s15_s11 = sshll.u32 %s192_s0, 4  ;;  %s165_s12 = smov [#allocation2]   ;;  %s16_s11 = int_to_ptr.hbm [resolvable:$true] %s15_s11 }
   0x3   :  { %s17_s13 = sshll.u32 %s165_s12, 4  ;;  %s26_s16 = sshll.u32 %s193_s1, 4  ;;  %s18_s13 = int_to_ptr.vmem [resolvable:$true] %s17_s13  ;;  %s27_s16 = int_to_ptr.hbm [resolvable:$true] %s26_s16 }
   0x4   :  { %20 = dma.hbm_to_vmem [thread:$0]  %s16_s11, 16, %s18_s13, [#allocation3]  }
   0x5   :  { %s166_s17 = smov [#allocation5]  }
   0x6   :  { %s28_s18 = sshll.u32 %s166_s17, 4  ;;  %s29_s18 = int_to_ptr.vmem [resolvable:$true] %s28_s18 }
   0x7   :  { %31 = dma.hbm_to_vmem [thread:$0]  %s27_s16, 32, %s29_s18, [#allocation6]  }
   0x8   :  { %159 = dma.done.wait [#allocation3], 16  }
   0x9   :  { %160 = vsyncadd [#allocation3], 4294967280 }
   0xa   :  { %161 = dma.done.wait [#allocation6], 32  }
   0xb   :  { %162 = vsyncadd [#allocation6], 4294967264  ;;  %vm47_vm0 = vcmask 1041408   ;;  %v42_v0 = vld [vmem:[#allocation5] sm:$0x3]  ;;  %vm43_vm1 = vcmask 31744  }
   0xc   :  { %v49_v1 = vsel %vm47_vm0, %v42_v0, 0  ;;  %v41_v2 = vld [vmem:[#allocation2] sm:$0x1]  ;;  %s167_s0 = smov [#allocation7]   ;;  %s72_s21 = sshll.u32 %s194_s2, 4  ;;  %s73_s21 = int_to_ptr.hbm [resolvable:$true] %s72_s21 }
   0xd   :  { %58 = vmatpush.bf16.msra.mxu0 %v49_v1  ;;  %s70_s19 = sshll.u32 %s167_s0, 4  ;;  %s71_s19 = int_to_ptr.vmem [resolvable:$true] %s70_s19 }
  0x10   :  { %83 = vmatmul.msk.bf16.vlgmr.msra.gmra.mxu0 %vm43_vm1, %v41_v2 }
  0x8d   :  { %v60_v3 = vpop.f32.mrf.mxu0 }
  0x8e   :  { %64 = vst [vmem:[#allocation7] sm:$0x3] %v60_v3 }
  0x8f   :  { %75 = dma.vmem_to_hbm [thread:$0]  %s71_s19, 32, %s73_s21, [#allocation4]  }
  0x95   :  { %v62_v4 = vpop.f32.mrf.mxu0 }
  0x96   :  { %163 = dma.done.wait [#allocation4], 32  }
  0x97   :  { %164 = vsyncadd [#allocation4], 4294967264 }
  0x98   :  { %80 = vsyncpa [#allocation3], 1 }
  0x99   :  { %81 = vsyncpa [#allocation6], 1 }
  0x9a   :  { %82 = vsyncpa [#allocation4], 1 }

</bundles_post_ra>
